<compile_context>
chip_gen: v7x
topology: tpu7x:2x2x1
jax: 0.10.0
libtpu: 0.0.40
codegen_flags: <defaults>
</compile_context>

<pallas_src>
import math

import numpy as np
import jax
import jax.numpy as jnp
from jax import lax
from jax.experimental import pallas as pl
from jax.experimental.pallas import tpu as pltpu

_LN_EPS = 1e-5


# --------------------------------------------------------------------------- #
# small helpers
# --------------------------------------------------------------------------- #
def _round_up(x, m):
    return ((x + m - 1) // m) * m


def _pad_last(x, target):
    pad = target - x.shape[-1]
    if pad == 0:
        return x
    return jnp.pad(x, [(0, 0)] * (x.ndim - 1) + [(0, pad)])


def _pad_last2(x, t0, t1):
    p0, p1 = t0 - x.shape[-2], t1 - x.shape[-1]
    if p0 == 0 and p1 == 0:
        return x
    return jnp.pad(x, [(0, 0)] * (x.ndim - 2) + [(0, p0), (0, p1)])


def _full_spec(arr):
    zeros = (0,) * arr.ndim
    return pl.BlockSpec(arr.shape, lambda t: zeros)   # constant index -> resident


def _radial_embedding(edge_len, r_max, num_basis, tanh_n):
    r_safe = jnp.maximum(edge_len, 1e-6)               # BesselBasis divides by r
    freqs = (math.pi / r_max) * jnp.arange(1, num_basis + 1, dtype=jnp.float32)[None, :]
    bessel = np.float32(math.sqrt(2.0 / r_max)) * jnp.sin(r_safe * freqs) / r_safe
    # TODO(synk): exact TanhCutoff definition unavailable; using tanh(1-r/rmax)**n
    cut = lax.integer_pow(jnp.tanh(1.0 - edge_len / r_max), int(round(tanh_n)))
    return bessel * cut


# --------------------------------------------------------------------------- #
# fused forward
# --------------------------------------------------------------------------- #
def scalar_interaction_forward(pos, edge_index, node_attrs, layer_params, *,
                               r_max, num_basis, tanh_n, latent_dim, recycles=3):
    N, A = node_attrs.shape
    E = edge_index.shape[1]
    B = int(num_basis)
    L = int(latent_dim)
    num_layers = len(layer_params)
    Lp = _round_up(L, 128)                 # lane-dense latent dim
    Dp = _round_up(2 * A + B, 128)         # lane-dense edge-input dim

    center_idx, neighbor_idx = edge_index[0], edge_index[1]

    # ---- recycle & layer invariant precompute (hoisted out of the kernel) ----
    edge_vec = pos[neighbor_idx] - pos[center_idx]
    edge_len = jnp.sqrt(jnp.sum(edge_vec * edge_vec, axis=-1, keepdims=True))    # (E,1)
    rbf = _radial_embedding(edge_len, r_max, B, tanh_n).astype(jnp.float32)      # (E,B)

    center = node_attrs[center_idx].astype(jnp.float32)                          # (E,A)
    neighbor = node_attrs[neighbor_idx].astype(jnp.float32)                      # (E,A)

    # edge_feature_mlp LayerNorm statistics are layer/recycle invariant -> hoist.
    x = jnp.concatenate([center, neighbor, rbf], axis=-1)                        # (E,D)
    mu = jnp.mean(x, axis=-1, keepdims=True)
    var = jnp.mean((x - mu) ** 2, axis=-1, keepdims=True)                        # stable 2-pass
    x_norm = _pad_last((x - mu) * lax.rsqrt(var + _LN_EPS), Dp).astype(jnp.bfloat16)

    # central-attr contributions to the attention LayerNorm are invariant too.
    csum = jnp.sum(center, axis=-1, keepdims=True)                               # (E,1)
    csumsq = jnp.sum(center * center, axis=-1, keepdims=True)                    # (E,1)

    node_ids = jnp.arange(N)
    oh = (center_idx[:, None] == node_ids[None, :]).astype(jnp.bfloat16)         # (E,N)
    ohT = (node_ids[:, None] == center_idx[None, :]).astype(jnp.bfloat16)        # (N,E) pre-transposed
    # TODO(synk): for large N/E replace the dense one-hot scatter/gather with a
    # blocked segment-sum over sorted center_idx (PrefetchScalarGridSpec) and
    # single-buffer the invariants (pl.Buffered) to stay under the v7x 64MiB VMEM.

    # ---- host-side parameter folding: LN gamma/beta into W/b, FiLM, resnet ----
    def fold(p):
        # edge_feature_mlp: Linear(LayerNorm(cat[center, neighbor, rbf])) -> L
        ef_w = p["ef_ln_g"][:, None] * p["ef_w"]                          # (D,L)
        ef_b = p["ef_b"] + p["ef_ln_b"] @ p["ef_w"]                       # (L,)
        # attn_mlp: Linear(LayerNorm(cat[edge_features, center])) -> 1
        g_e, g_c = p["at_ln_g"][:L], p["at_ln_g"][L:]
        b_e, b_c = p["at_ln_b"][:L], p["at_ln_b"][L:]
        w_e, w_c = p["at_w"][:L, 0], p["at_w"][L:, 0]
        at_we = g_e * w_e                                                  # (L,)
        at_wc = g_c * w_c                                                  # (A,)
        at_cdot = center @ at_wc                                           # (E,) invariant per layer
        at_wsum = jnp.sum(at_we) + jnp.sum(at_wc)
        at_bias = p["at_b"][0] + jnp.sum(b_e * w_e) + jnp.sum(b_c * w_c)
        # latent_update_mlp: Linear(LayerNorm(cat[edge_features, pooled])) -> L
        ug_e, ug_p = p["up_ln_g"][:L], p["up_ln_g"][L:]
        up_b = p["up_b"] + p["up_ln_b"] @ p["up_w"]                        # (L,)
        up_we = ug_e[:, None] * p["up_w"][:L]                              # (L,L)
        up_wp = ug_p[:, None] * p["up_w"][L:]                              # (L,L)
        # FiLM gate depends only on rbf -> identical across recycles, precompute.
        h = rbf @ p["film_w1"]                                             # (E,2L)
        ha, hb = h[:, :L], h[:, L:]
        film = jax.nn.sigmoid((ha * jax.nn.sigmoid(ha) * hb) @ p["film_w2"])   # (E,L)
        # gated residual coefficients (pure function of the resnet parameter)
        alpha = jax.nn.sigmoid(p["resnet"][0])
        c_old = lax.rsqrt(alpha * alpha + 1.0)
        c_new = alpha * c_old
        return dict(ef_w=ef_w, ef_b=ef_b, at_we=at_we, at_cdot=at_cdot,
                    at_wsum=at_wsum, at_bias=at_bias, up_we=up_we, up_wp=up_wp,
                    up_b=up_b, film=film, c_old=c_old, c_new=c_new)

    folded = [fold(p) for p in layer_params]
    stk = lambda k: jnp.stack([f[k] for f in folded])

    # stacked, zero-padded (padding never changes results over the true dims)
    ef_w = _pad_last2(stk("ef_w"), Dp, Lp).astype(jnp.bfloat16)       # (nl,Dp,Lp)
    ef_b = _pad_last(stk("ef_b"), Lp)[:, None, :]                      # (nl,1,Lp)
    at_we = _pad_last(stk("at_we"), Lp)[:, None, :]                    # (nl,1,Lp)
    at_cdot = stk("at_cdot")[:, :, None]                               # (nl,E,1)
    up_we = _pad_last2(stk("up_we"), Lp, Lp).astype(jnp.bfloat16)      # (nl,Lp,Lp)
    up_wp = _pad_last2(stk("up_wp"), Lp, Lp).astype(jnp.bfloat16)      # (nl,Lp,Lp)
    up_b = _pad_last(stk("up_b"), Lp)[:, None, :]                      # (nl,1,Lp)
    film = _pad_last(stk("film"), Lp)                                  # (nl,E,Lp)
    at_wsum = stk("at_wsum")                                           # (nl,) SMEM
    at_bias = stk("at_bias")                                           # (nl,) SMEM
    c_old = stk("c_old")                                               # (nl,) SMEM
    c_new = stk("c_new")                                               # (nl,) SMEM

    d_at = float(L + A)      # true LayerNorm dims (padding lanes are zero)
    d_up = float(2 * L)
    bf16, f32 = jnp.bfloat16, jnp.float32

    # ------------------------------ kernel ------------------------------------
    def kernel(xn_ref, csum_ref, csq_ref, oh_ref, ohT_ref,
               ef_w_ref, ef_b_ref, at_we_ref, at_cdot_ref,
               up_we_ref, up_wp_ref, up_b_ref, film_ref,
               at_wsum_ref, at_bias_ref, c_old_ref, c_new_ref,
               out_ref):
        t = pl.program_id(0)
        layer = t % num_layers                 # which interaction block this step runs

        @pl.when(t == 0)
        def _init():
            out_ref[...] = jnp.zeros_like(out_ref)    # latents start at zero

        latents = out_ref[...]                                            # (E,Lp) f32

        # --- edge feature MLP: LN hoisted host-side, gamma/beta folded -------
        ef = jnp.dot(xn_ref[...], ef_w_ref[layer],
                     preferred_element_type=f32) + ef_b_ref[layer]        # (E,Lp)

        ef_sum = jnp.sum(ef, axis=-1, keepdims=True)                      # (E,1)
        ef_sumsq = jnp.sum(ef * ef, axis=-1, keepdims=True)               # (E,1)

        # --- attention score: Linear(LayerNorm(cat[ef, center])) -> (E,1) ----
        # center contributions are invariant & precomputed (csum/csq/at_cdot).
        mu = (ef_sum + csum_ref[...]) / d_at
        inv = lax.rsqrt((ef_sumsq + csq_ref[...]) / d_at - mu * mu + _LN_EPS)
        efdot = jnp.sum(ef * at_we_ref[layer], axis=-1, keepdims=True)
        score = inv * (efdot + at_cdot_ref[layer] - mu * at_wsum_ref[layer]) \
            + at_bias_ref[layer]                                          # (E,1)

        # global softmax over all edges (dim 0); all E live in this block.
        m = jnp.max(score, axis=0, keepdims=True)
        e = jnp.exp(score - m)
        denom = jnp.sum(e, axis=0, keepdims=True)
        w = e * pl.reciprocal(denom, approx=True)                         # EUP slot

        # --- scatter-add over edge_center + gather back (bf16 MXU) -----------
        weighted = (w * ef).astype(bf16)
        pooled = jnp.dot(ohT_ref[...], weighted,
                         preferred_element_type=f32)                     # (N,Lp)
        pooled_e = jnp.dot(oh_ref[...], pooled.astype(bf16),
                           preferred_element_type=f32)                   # (E,Lp)

        # --- latent update MLP: Linear(LayerNorm(cat[ef, pooled_e])) ---------
        pe_sum = jnp.sum(pooled_e, axis=-1, keepdims=True)
        pe_sumsq = jnp.sum(pooled_e * pooled_e, axis=-1, keepdims=True)
        mu2 = (ef_sum + pe_sum) / d_up
        inv2 = lax.rsqrt((ef_sumsq + pe_sumsq) / d_up - mu2 * mu2 + _LN_EPS)
        ef_n = ((ef - mu2) * inv2).astype(bf16)
        pe_n = ((pooled_e - mu2) * inv2).astype(bf16)
        upd = (jnp.dot(ef_n, up_we_ref[layer], preferred_element_type=f32)
               + jnp.dot(pe_n, up_wp_ref[layer], preferred_element_type=f32)
               + up_b_ref[layer])                                         # (E,Lp)

        # --- FiLM gate (precomputed, recycle-invariant) + gated residual -----
        upd = upd * film_ref[layer]
        out_ref[...] = c_old_ref[layer] * latents + c_new_ref[layer] * upd

    # ------------------------------ pallas_call --------------------------------
    invariants = (x_norm, csum, csumsq, oh, ohT)
    vmem_params = (ef_w, ef_b, at_we, at_cdot, up_we, up_wp, up_b, film)
    smem_params = (at_wsum, at_bias, c_old, c_new)

    in_specs = ([_full_spec(a) for a in invariants]
                + [_full_spec(a) for a in vmem_params]
                + [pl.BlockSpec(memory_space=pltpu.MemorySpace.SMEM)
                   for _ in smem_params])

    out = pl.pallas_call(
        kernel,
        grid=(recycles * num_layers,),
        in_specs=in_specs,
        out_specs=pl.BlockSpec((E, Lp), lambda t: (0, 0)),   # revisited carry, lane-dense
        out_shape=jax.ShapeDtypeStruct((E, Lp), jnp.float32),
        compiler_params=pltpu.CompilerParams(
            dimension_semantics=("arbitrary",),              # sequential latent carry
            vmem_limit_bytes=48 * 1024 * 1024),              # explicit budget (< v7x 64 MiB)
    )(*invariants, *vmem_params, *smem_params)

    return out[:, :L]
    # TODO(synk): on v7x a core_parallel split of the edge axis (partial softmax
    # + partial pooling combined via CMEM) could use the second TensorCore.


# --------------------------------------------------------------------------- #
# pure-JAX reference (same assumed helper semantics), for verification
# --------------------------------------------------------------------------- #
def scalar_interaction_reference(pos, edge_index, node_attrs, layer_params, *,
                                 r_max, num_basis, tanh_n, latent_dim, recycles=3):
    N, _ = node_attrs.shape
    E = edge_index.shape[1]
    L = latent_dim
    center_idx, neighbor_idx = edge_index[0], edge_index[1]
    edge_vec = pos[neighbor_idx] - pos[center_idx]
    edge_len = jnp.sqrt(jnp.sum(edge_vec ** 2, axis=-1, keepdims=True))
    rbf = _radial_embedding(edge_len, r_max, num_basis, tanh_n).astype(jnp.float32)
    center = node_attrs[center_idx].astype(jnp.float32)
    neighbor = node_attrs[neighbor_idx].astype(jnp.float32)

    def ln(x, g, b):
        mu = jnp.mean(x, -1, keepdims=True)
        var = jnp.mean((x - mu) ** 2, -1, keepdims=True)
        return (x - mu) * lax.rsqrt(var + _LN_EPS) * g + b

    latents = jnp.zeros((E, L), jnp.float32)
    for _ in range(recycles):
        for p in layer_params:
            edge_input = jnp.concatenate([center, neighbor, rbf], axis=-1)
            ef = ln(edge_input, p["ef_ln_g"], p["ef_ln_b"]) @ p["ef_w"] + p["ef_b"]
            attn_in = jnp.concatenate([ef, center], axis=-1)
            score = ln(attn_in, p["at_ln_g"], p["at_ln_b"]) @ p["at_w"] + p["at_b"]
            w = jax.nn.softmax(score[:, 0], axis=0)[:, None]
            pooled = jnp.zeros((N, L), jnp.float32).at[center_idx].add(w * ef)
            upd_in = jnp.concatenate([ef, pooled[center_idx]], axis=-1)
            upd = ln(upd_in, p["up_ln_g"], p["up_ln_b"]) @ p["up_w"] + p["up_b"]
            h = rbf @ p["film_w1"]
            ha, hb = h[:, :L], h[:, L:]
            film = jax.nn.sigmoid((ha * jax.nn.sigmoid(ha) * hb) @ p["film_w2"])
            upd = upd * film
            alpha = jax.nn.sigmoid(p["resnet"][0])
            c_old = lax.rsqrt(alpha * alpha + 1.0)
            latents = c_old * latents + alpha * c_old * upd
    return latents


# --------------------------------------------------------------------------- #
# synthetic per-layer parameters (torch-module layout: LN gamma/beta + Linear)
# --------------------------------------------------------------------------- #
def init_block_params(key, A, B, L):
    ks = jax.random.split(key, 5)
    d_ef, d_at, d_up = 2 * A + B, L + A, 2 * L

    def lin(k, din, dout):
        return jax.random.normal(k, (din, dout), jnp.float32) / np.sqrt(din)

    return dict(
        ef_ln_g=jnp.ones((d_ef,), jnp.float32), ef_ln_b=jnp.zeros((d_ef,), jnp.float32),
        ef_w=lin(ks[0], d_ef, L), ef_b=jnp.zeros((L,), jnp.float32),
        at_ln_g=jnp.ones((d_at,), jnp.float32), at_ln_b=jnp.zeros((d_at,), jnp.float32),
        at_w=lin(ks[1], d_at, 1), at_b=jnp.zeros((1,), jnp.float32),
        up_ln_g=jnp.ones((d_up,), jnp.float32), up_ln_b=jnp.zeros((d_up,), jnp.float32),
        up_w=lin(ks[2], d_up, L), up_b=jnp.zeros((L,), jnp.float32),
        film_w1=lin(ks[3], B, 2 * L), film_w2=lin(ks[4], L, L),
        resnet=jnp.zeros((1,), jnp.float32),
    )


if __name__ == "__main__":
    N, A, E, B, L = 8, 8, 16, 8, 32          # nodes, attr dim, edges, num_basis, latent_dim
    num_layers, recycles = 2, 2
    r_max, tanh_n = 4.0, 6.0

    key = jax.random.PRNGKey(0)
    kp, ke, kn, ka, kw = jax.random.split(key, 5)
    pos = jax.random.uniform(kp, (N, 3), jnp.float32, 0.0, r_max)
    src = jax.random.randint(ke, (E,), 0, N)
    dst = (src + 1 + jax.random.randint(kn, (E,), 0, N - 1)) % N   # neighbor != center
    edge_index = jnp.stack([src, dst])                              # (2, E)
    node_attrs = jax.random.normal(ka, (N, A), jnp.float32)

    layer_keys = jax.random.split(kw, num_layers)
    layer_params = [init_block_params(k, A, B, L) for k in layer_keys]

    out = scalar_interaction_forward(pos, edge_index, node_attrs, layer_params,
                                     r_max=r_max, num_basis=B, tanh_n=tanh_n,
                                     latent_dim=L, recycles=recycles)
    out = jax.block_until_ready(out)

    ref = scalar_interaction_reference(pos, edge_index, node_attrs, layer_params,
                                       r_max=r_max, num_basis=B, tanh_n=tanh_n,
                                       latent_dim=L, recycles=recycles)
    assert out.shape == (E, L)
    assert bool(jnp.all(jnp.isfinite(out)))
    assert bool(jnp.allclose(out, ref, atol=5e-2, rtol=5e-2))   # bf16 MXU tolerance
    print("KERNEL_OK")
</pallas_src>

<mosaic_0001>
module attributes {stable_mosaic.version = 11 : i64} {
  func.func @kernel(%arg0: i32, %arg1: memref<16x128xbf16, #tpu.memory_space<vmem>>, %arg2: memref<16x1xf32, #tpu.memory_space<vmem>>, %arg3: memref<16x1xf32, #tpu.memory_space<vmem>>, %arg4: memref<16x8xbf16, #tpu.memory_space<vmem>>, %arg5: memref<8x16xbf16, #tpu.memory_space<vmem>>, %arg6: memref<2x128x128xbf16, #tpu.memory_space<vmem>>, %arg7: memref<2x1x128xf32, #tpu.memory_space<vmem>>, %arg8: memref<2x1x128xf32, #tpu.memory_space<vmem>>, %arg9: memref<2x16x1xf32, #tpu.memory_space<vmem>>, %arg10: memref<2x128x128xbf16, #tpu.memory_space<vmem>>, %arg11: memref<2x128x128xbf16, #tpu.memory_space<vmem>>, %arg12: memref<2x1x128xf32, #tpu.memory_space<vmem>>, %arg13: memref<2x16x128xf32, #tpu.memory_space<vmem>>, %arg14: memref<2xf32, #tpu.memory_space<smem>>, %arg15: memref<2xf32, #tpu.memory_space<smem>>, %arg16: memref<2xf32, #tpu.memory_space<smem>>, %arg17: memref<2xf32, #tpu.memory_space<smem>>, %arg18: memref<16x128xf32, #tpu.memory_space<vmem>>) attributes {dimension_semantics = [#tpu.dimension_semantics<arbitrary>], iteration_bounds = array<i64: 4>, scalar_prefetch = 0 : i64, scratch_operands = 0 : i64, tpu.core_type = #tpu.core_type<tc>, window_params = [{pipeline_mode = #tpu.pipeline_mode<synchronous>, transform_indices = @transform_0, window_bounds = array<i64: 16, 128>}, {pipeline_mode = #tpu.pipeline_mode<synchronous>, transform_indices = @transform_1, window_bounds = array<i64: 16, 1>}, {pipeline_mode = #tpu.pipeline_mode<synchronous>, transform_indices = @transform_2, window_bounds = array<i64: 16, 1>}, {pipeline_mode = #tpu.pipeline_mode<synchronous>, transform_indices = @transform_3, window_bounds = array<i64: 16, 8>}, {pipeline_mode = #tpu.pipeline_mode<synchronous>, transform_indices = @transform_4, window_bounds = array<i64: 8, 16>}, {pipeline_mode = #tpu.pipeline_mode<synchronous>, transform_indices = @transform_5, window_bounds = array<i64: 2, 128, 128>}, {pipeline_mode = #tpu.pipeline_mode<synchronous>, transform_indices = @transform_6, window_bounds = array<i64: 2, 1, 128>}, {pipeline_mode = #tpu.pipeline_mode<synchronous>, transform_indices = @transform_7, window_bounds = array<i64: 2, 1, 128>}, {pipeline_mode = #tpu.pipeline_mode<synchronous>, transform_indices = @transform_8, window_bounds = array<i64: 2, 16, 1>}, {pipeline_mode = #tpu.pipeline_mode<synchronous>, transform_indices = @transform_9, window_bounds = array<i64: 2, 128, 128>}, {pipeline_mode = #tpu.pipeline_mode<synchronous>, transform_indices = @transform_10, window_bounds = array<i64: 2, 128, 128>}, {pipeline_mode = #tpu.pipeline_mode<synchronous>, transform_indices = @transform_11, window_bounds = array<i64: 2, 1, 128>}, {pipeline_mode = #tpu.pipeline_mode<synchronous>, transform_indices = @transform_12, window_bounds = array<i64: 2, 16, 128>}, {transform_indices = @transform_13, window_bounds = array<i64: 2>}, {transform_indices = @transform_14, window_bounds = array<i64: 2>}, {transform_indices = @transform_15, window_bounds = array<i64: 2>}, {transform_indices = @transform_16, window_bounds = array<i64: 2>}, {pipeline_mode = #tpu.pipeline_mode<synchronous>, transform_indices = @transform_17, window_bounds = array<i64: 16, 128>}]} {
    %c2_i32 = arith.constant 2 : i32
    %c0_i32 = arith.constant 0 : i32
    %0 = arith.cmpi eq, %c2_i32, %c0_i32 : i32
    %c1_i32 = arith.constant 1 : i32
    %1 = arith.select %0, %c1_i32, %c2_i32 : i32
    %2 = arith.remsi %arg0, %1 : i32
    %c0_i32_0 = arith.constant 0 : i32
    %3 = arith.cmpi ne, %2, %c0_i32_0 : i32
    %c0_i32_1 = arith.constant 0 : i32
    %4 = arith.cmpi slt, %2, %c0_i32_1 : i32
    %c0_i32_2 = arith.constant 0 : i32
    %5 = arith.cmpi slt, %1, %c0_i32_2 : i32
    %6 = arith.xori %4, %5 : i1
    %7 = arith.andi %6, %3 : i1
    %8 = arith.addi %2, %1 : i32
    %9 = arith.select %7, %8, %2 : i32
    %c0_i32_3 = arith.constant 0 : i32
    %10 = arith.cmpi eq, %arg0, %c0_i32_3 : i32
    %11 = arith.extui %10 : i1 to i32
    %c0_i32_4 = arith.constant 0 : i32
    %12 = arith.cmpi ne, %11, %c0_i32_4 : i32
    scf.if %12 {
      %cst_51 = arith.constant 0.000000e+00 : f32
      %135 = vector.broadcast %cst_51 : f32 to vector<16x128xf32>
      %c0_52 = arith.constant 0 : index
      %c0_53 = arith.constant 0 : index
      %136 = vector.load %arg18[%c0_52, %c0_53] : memref<16x128xf32, #tpu.memory_space<vmem>>, vector<16x128xf32>
      tpu.vector_store %arg18[%c0_52, %c0_53], %135 {strides = array<i32>} : memref<16x128xf32, #tpu.memory_space<vmem>>, vector<16x128xf32>,
    } else {
    }
    %c0 = arith.constant 0 : index
    %c0_5 = arith.constant 0 : index
    %13 = vector.load %arg18[%c0, %c0_5] : memref<16x128xf32, #tpu.memory_space<vmem>>, vector<16x128xf32>
    %c0_6 = arith.constant 0 : index
    %c0_7 = arith.constant 0 : index
    %14 = vector.load %arg1[%c0_6, %c0_7] : memref<16x128xbf16, #tpu.memory_space<vmem>>, vector<16x128xbf16>
    %15 = arith.index_cast %9 : i32 to index
    %c0_8 = arith.constant 0 : index
    %c0_9 = arith.constant 0 : index
    %16 = vector.load %arg6[%15, %c0_8, %c0_9] : memref<2x128x128xbf16, #tpu.memory_space<vmem>>, vector<1x128x128xbf16>
    %17 = vector.shape_cast %16 : vector<1x128x128xbf16> to vector<128x128xbf16>
    %cst = arith.constant dense<0.000000e+00> : vector<16x128xf32>
    %18 = tpu.matmul %14, %17, %cst {dimension_numbers = #tpu.dot_dimension_numbers<[1], [0], [0], [1], [0, 0, 1, 1], [], []>} : vector<16x128xbf16>, vector<128x128xbf16>, vector<16x128xf32> -> vector<16x128xf32>
    %19 = arith.index_cast %9 : i32 to index
    %c0_10 = arith.constant 0 : index
    %c0_11 = arith.constant 0 : index
    %20 = vector.load %arg7[%19, %c0_10, %c0_11] : memref<2x1x128xf32, #tpu.memory_space<vmem>>, vector<1x1x128xf32>
    %21 = vector.shape_cast %20 : vector<1x1x128xf32> to vector<1x128xf32>
    %22 = vector.broadcast %21 : vector<1x128xf32> to vector<16x128xf32>
    %23 = arith.addf %18, %22 : vector<16x128xf32>
    %cst_12 = arith.constant dense<0.000000e+00> : vector<16xf32>
    %24 = vector.multi_reduction <add>, %23, %cst_12 [1] : vector<16x128xf32> to vector<16xf32>
    %25 = vector.shape_cast %24 : vector<16xf32> to vector<16x1xf32>
    %26 = arith.mulf %23, %23 : vector<16x128xf32>
    %cst_13 = arith.constant dense<0.000000e+00> : vector<16xf32>
    %27 = vector.multi_reduction <add>, %26, %cst_13 [1] : vector<16x128xf32> to vector<16xf32>
    %28 = vector.shape_cast %27 : vector<16xf32> to vector<16x1xf32>
    %c0_14 = arith.constant 0 : index
    %c0_15 = arith.constant 0 : index
    %29 = vector.load %arg2[%c0_14, %c0_15] : memref<16x1xf32, #tpu.memory_space<vmem>>, vector<16x1xf32>
    %30 = arith.addf %25, %29 : vector<16x1xf32>
    %cst_16 = arith.constant 4.000000e+01 : f32
    %31 = vector.broadcast %cst_16 : f32 to vector<16x1xf32>
    %32 = arith.divf %30, %31 : vector<16x1xf32>
    %c0_17 = arith.constant 0 : index
    %c0_18 = arith.constant 0 : index
    %33 = vector.load %arg3[%c0_17, %c0_18] : memref<16x1xf32, #tpu.memory_space<vmem>>, vector<16x1xf32>
    %34 = arith.addf %28, %33 : vector<16x1xf32>
    %cst_19 = arith.constant 4.000000e+01 : f32
    %35 = vector.broadcast %cst_19 : f32 to vector<16x1xf32>
    %36 = arith.divf %34, %35 : vector<16x1xf32>
    %37 = arith.mulf %32, %32 : vector<16x1xf32>
    %38 = arith.subf %36, %37 : vector<16x1xf32>
    %cst_20 = arith.constant 9.99999974E-6 : f32
    %39 = vector.broadcast %cst_20 : f32 to vector<16x1xf32>
    %40 = arith.addf %38, %39 : vector<16x1xf32>
    %41 = math.rsqrt %40 : vector<16x1xf32>
    %42 = arith.index_cast %9 : i32 to index
    %c0_21 = arith.constant 0 : index
    %c0_22 = arith.constant 0 : index
    %43 = vector.load %arg8[%42, %c0_21, %c0_22] : memref<2x1x128xf32, #tpu.memory_space<vmem>>, vector<1x1x128xf32>
    %44 = vector.shape_cast %43 : vector<1x1x128xf32> to vector<1x128xf32>
    %45 = vector.broadcast %44 : vector<1x128xf32> to vector<16x128xf32>
    %46 = arith.mulf %23, %45 : vector<16x128xf32>
    %cst_23 = arith.constant dense<0.000000e+00> : vector<16xf32>
    %47 = vector.multi_reduction <add>, %46, %cst_23 [1] : vector<16x128xf32> to vector<16xf32>
    %48 = vector.shape_cast %47 : vector<16xf32> to vector<16x1xf32>
    %49 = arith.index_cast %9 : i32 to index
    %c0_24 = arith.constant 0 : index
    %c0_25 = arith.constant 0 : index
    %50 = vector.load %arg9[%49, %c0_24, %c0_25] : memref<2x16x1xf32, #tpu.memory_space<vmem>>, vector<1x16x1xf32>
    %51 = vector.shape_cast %50 : vector<1x16x1xf32> to vector<16x1xf32>
    %52 = arith.addf %48, %51 : vector<16x1xf32>
    %53 = arith.index_cast %9 : i32 to index
    %54 = memref.load %arg14[%53] : memref<2xf32, #tpu.memory_space<smem>>
    %55 = vector.broadcast %54 : f32 to vector<16x1xf32>
    %56 = arith.mulf %32, %55 : vector<16x1xf32>
    %57 = arith.subf %52, %56 : vector<16x1xf32>
    %58 = arith.mulf %41, %57 : vector<16x1xf32>
    %59 = arith.index_cast %9 : i32 to index
    %60 = memref.load %arg15[%59] : memref<2xf32, #tpu.memory_space<smem>>
    %61 = vector.broadcast %60 : f32 to vector<16x1xf32>
    %62 = arith.addf %58, %61 : vector<16x1xf32>
    %cst_26 = arith.constant dense<0xFF800000> : vector<1xf32>
    %63 = vector.multi_reduction <maximumf>, %62, %cst_26 [0] : vector<16x1xf32> to vector<1xf32>
    %64 = vector.shape_cast %63 : vector<1xf32> to vector<1x1xf32>
    %65 = vector.broadcast %64 : vector<1x1xf32> to vector<16x1xf32>
    %66 = arith.subf %62, %65 : vector<16x1xf32>
    %67 = math.exp %66 : vector<16x1xf32>
    %cst_27 = arith.constant dense<0.000000e+00> : vector<1xf32>
    %68 = vector.multi_reduction <add>, %67, %cst_27 [0] : vector<16x1xf32> to vector<1xf32>
    %69 = vector.shape_cast %68 : vector<1xf32> to vector<1x1xf32>
    %70 = tpu.reciprocal %69 {approx = true} : vector<1x1xf32> -> vector<1x1xf32>
    %71 = vector.broadcast %70 : vector<1x1xf32> to vector<16x1xf32>
    %72 = arith.mulf %67, %71 : vector<16x1xf32>
    %73 = vector.broadcast %72 : vector<16x1xf32> to vector<16x128xf32>
    %74 = arith.mulf %73, %23 : vector<16x128xf32>
    %75 = arith.truncf %74 : vector<16x128xf32> to vector<16x128xbf16>
    %c0_28 = arith.constant 0 : index
    %c0_29 = arith.constant 0 : index
    %76 = vector.load %arg5[%c0_28, %c0_29] : memref<8x16xbf16, #tpu.memory_space<vmem>>, vector<8x16xbf16>
    %cst_30 = arith.constant dense<0.000000e+00> : vector<8x128xf32>
    %77 = tpu.matmul %76, %75, %cst_30 {dimension_numbers = #tpu.dot_dimension_numbers<[1], [0], [0], [1], [0, 0, 1, 1], [], []>} : vector<8x16xbf16>, vector<16x128xbf16>, vector<8x128xf32> -> vector<8x128xf32>
    %c0_31 = arith.constant 0 : index
    %c0_32 = arith.constant 0 : index
    %78 = vector.load %arg4[%c0_31, %c0_32] : memref<16x8xbf16, #tpu.memory_space<vmem>>, vector<16x8xbf16>
    %79 = arith.truncf %77 : vector<8x128xf32> to vector<8x128xbf16>
    %cst_33 = arith.constant dense<0.000000e+00> : vector<16x128xf32>
    %80 = tpu.matmul %78, %79, %cst_33 {dimension_numbers = #tpu.dot_dimension_numbers<[1], [0], [0], [1], [0, 0, 1, 1], [], []>} : vector<16x8xbf16>, vector<8x128xbf16>, vector<16x128xf32> -> vector<16x128xf32>
    %cst_34 = arith.constant dense<0.000000e+00> : vector<16xf32>
    %81 = vector.multi_reduction <add>, %80, %cst_34 [1] : vector<16x128xf32> to vector<16xf32>
    %82 = vector.shape_cast %81 : vector<16xf32> to vector<16x1xf32>
    %83 = arith.mulf %80, %80 : vector<16x128xf32>
    %cst_35 = arith.constant dense<0.000000e+00> : vector<16xf32>
    %84 = vector.multi_reduction <add>, %83, %cst_35 [1] : vector<16x128xf32> to vector<16xf32>
    %85 = vector.shape_cast %84 : vector<16xf32> to vector<16x1xf32>
    %86 = arith.addf %25, %82 : vector<16x1xf32>
    %cst_36 = arith.constant 6.400000e+01 : f32
    %87 = vector.broadcast %cst_36 : f32 to vector<16x1xf32>
    %88 = arith.divf %86, %87 : vector<16x1xf32>
    %89 = arith.addf %28, %85 : vector<16x1xf32>
    %cst_37 = arith.constant 6.400000e+01 : f32
    %90 = vector.broadcast %cst_37 : f32 to vector<16x1xf32>
    %91 = arith.divf %89, %90 : vector<16x1xf32>
    %92 = arith.mulf %88, %88 : vector<16x1xf32>
    %93 = arith.subf %91, %92 : vector<16x1xf32>
    %cst_38 = arith.constant 9.99999974E-6 : f32
    %94 = vector.broadcast %cst_38 : f32 to vector<16x1xf32>
    %95 = arith.addf %93, %94 : vector<16x1xf32>
    %96 = math.rsqrt %95 : vector<16x1xf32>
    %97 = vector.broadcast %88 : vector<16x1xf32> to vector<16x128xf32>
    %98 = arith.subf %23, %97 : vector<16x128xf32>
    %99 = vector.broadcast %96 : vector<16x1xf32> to vector<16x128xf32>
    %100 = arith.mulf %98, %99 : vector<16x128xf32>
    %101 = arith.truncf %100 : vector<16x128xf32> to vector<16x128xbf16>
    %102 = vector.broadcast %88 : vector<16x1xf32> to vector<16x128xf32>
    %103 = arith.subf %80, %102 : vector<16x128xf32>
    %104 = vector.broadcast %96 : vector<16x1xf32> to vector<16x128xf32>
    %105 = arith.mulf %103, %104 : vector<16x128xf32>
    %106 = arith.truncf %105 : vector<16x128xf32> to vector<16x128xbf16>
    %107 = arith.index_cast %9 : i32 to index
    %c0_39 = arith.constant 0 : index
    %c0_40 = arith.constant 0 : index
    %108 = vector.load %arg10[%107, %c0_39, %c0_40] : memref<2x128x128xbf16, #tpu.memory_space<vmem>>, vector<1x128x128xbf16>
    %109 = vector.shape_cast %108 : vector<1x128x128xbf16> to vector<128x128xbf16>
    %cst_41 = arith.constant dense<0.000000e+00> : vector<16x128xf32>
    %110 = tpu.matmul %101, %109, %cst_41 {dimension_numbers = #tpu.dot_dimension_numbers<[1], [0], [0], [1], [0, 0, 1, 1], [], []>} : vector<16x128xbf16>, vector<128x128xbf16>, vector<16x128xf32> -> vector<16x128xf32>
    %111 = arith.index_cast %9 : i32 to index
    %c0_42 = arith.constant 0 : index
    %c0_43 = arith.constant 0 : index
    %112 = vector.load %arg11[%111, %c0_42, %c0_43] : memref<2x128x128xbf16, #tpu.memory_space<vmem>>, vector<1x128x128xbf16>
    %113 = vector.shape_cast %112 : vector<1x128x128xbf16> to vector<128x128xbf16>
    %cst_44 = arith.constant dense<0.000000e+00> : vector<16x128xf32>
    %114 = tpu.matmul %106, %113, %cst_44 {dimension_numbers = #tpu.dot_dimension_numbers<[1], [0], [0], [1], [0, 0, 1, 1], [], []>} : vector<16x128xbf16>, vector<128x128xbf16>, vector<16x128xf32> -> vector<16x128xf32>
    %115 = arith.addf %110, %114 : vector<16x128xf32>
    %116 = arith.index_cast %9 : i32 to index
    %c0_45 = arith.constant 0 : index
    %c0_46 = arith.constant 0 : index
    %117 = vector.load %arg12[%116, %c0_45, %c0_46] : memref<2x1x128xf32, #tpu.memory_space<vmem>>, vector<1x1x128xf32>
    %118 = vector.shape_cast %117 : vector<1x1x128xf32> to vector<1x128xf32>
    %119 = vector.broadcast %118 : vector<1x128xf32> to vector<16x128xf32>
    %120 = arith.addf %115, %119 : vector<16x128xf32>
    %121 = arith.index_cast %9 : i32 to index
    %c0_47 = arith.constant 0 : index
    %c0_48 = arith.constant 0 : index
    %122 = vector.load %arg13[%121, %c0_47, %c0_48] : memref<2x16x128xf32, #tpu.memory_space<vmem>>, vector<1x16x128xf32>
    %123 = vector.shape_cast %122 : vector<1x16x128xf32> to vector<16x128xf32>
    %124 = arith.mulf %120, %123 : vector<16x128xf32>
    %125 = arith.index_cast %9 : i32 to index
    %126 = memref.load %arg16[%125] : memref<2xf32, #tpu.memory_space<smem>>
    %127 = vector.broadcast %126 : f32 to vector<16x128xf32>
    %128 = arith.mulf %127, %13 : vector<16x128xf32>
    %129 = arith.index_cast %9 : i32 to index
    %130 = memref.load %arg17[%129] : memref<2xf32, #tpu.memory_space<smem>>
    %131 = vector.broadcast %130 : f32 to vector<16x128xf32>
    %132 = arith.mulf %131, %124 : vector<16x128xf32>
    %133 = arith.addf %128, %132 : vector<16x128xf32>
    %c0_49 = arith.constant 0 : index
    %c0_50 = arith.constant 0 : index
    %134 = vector.load %arg18[%c0_49, %c0_50] : memref<16x128xf32, #tpu.memory_space<vmem>>, vector<16x128xf32>
    tpu.vector_store %arg18[%c0_49, %c0_50], %133 {strides = array<i32>} : memref<16x128xf32, #tpu.memory_space<vmem>>, vector<16x128xf32>,
    return
  }
  func.func @transform_0(%arg0: i32) -> (i32, i32) {
    %c0_i32 = arith.constant 0 : i32
    %c0_i32_0 = arith.constant 0 : i32
    %c0_i32_1 = arith.constant 0 : i32
    return %c0_i32, %c0_i32_0 : i32, i32
  }
  func.func @transform_1(%arg0: i32) -> (i32, i32) {
    %c0_i32 = arith.constant 0 : i32
    %c0_i32_0 = arith.constant 0 : i32
    %c0_i32_1 = arith.constant 0 : i32
    return %c0_i32, %c0_i32_0 : i32, i32
  }
  func.func @transform_2(%arg0: i32) -> (i32, i32) {
    %c0_i32 = arith.constant 0 : i32
    %c0_i32_0 = arith.constant 0 : i32
    %c0_i32_1 = arith.constant 0 : i32
    return %c0_i32, %c0_i32_0 : i32, i32
  }
  func.func @transform_3(%arg0: i32) -> (i32, i32) {
    %c0_i32 = arith.constant 0 : i32
    %c0_i32_0 = arith.constant 0 : i32
    %c0_i32_1 = arith.constant 0 : i32
    return %c0_i32, %c0_i32_0 : i32, i32
  }
  func.func @transform_4(%arg0: i32) -> (i32, i32) {
    %c0_i32 = arith.constant 0 : i32
    %c0_i32_0 = arith.constant 0 : i32
    %c0_i32_1 = arith.constant 0 : i32
    return %c0_i32, %c0_i32_0 : i32, i32
  }
  func.func @transform_5(%arg0: i32) -> (i32, i32, i32) {
    %c0_i32 = arith.constant 0 : i32
    %c0_i32_0 = arith.constant 0 : i32
    %c0_i32_1 = arith.constant 0 : i32
    %c0_i32_2 = arith.constant 0 : i32
    return %c0_i32, %c0_i32_0, %c0_i32_1 : i32, i32, i32
  }
  func.func @transform_6(%arg0: i32) -> (i32, i32, i32) {
    %c0_i32 = arith.constant 0 : i32
    %c0_i32_0 = arith.constant 0 : i32
    %c0_i32_1 = arith.constant 0 : i32
    %c0_i32_2 = arith.constant 0 : i32
    return %c0_i32, %c0_i32_0, %c0_i32_1 : i32, i32, i32
  }
  func.func @transform_7(%arg0: i32) -> (i32, i32, i32) {
    %c0_i32 = arith.constant 0 : i32
    %c0_i32_0 = arith.constant 0 : i32
    %c0_i32_1 = arith.constant 0 : i32
    %c0_i32_2 = arith.constant 0 : i32
    return %c0_i32, %c0_i32_0, %c0_i32_1 : i32, i32, i32
  }
  func.func @transform_8(%arg0: i32) -> (i32, i32, i32) {
    %c0_i32 = arith.constant 0 : i32
    %c0_i32_0 = arith.constant 0 : i32
    %c0_i32_1 = arith.constant 0 : i32
    %c0_i32_2 = arith.constant 0 : i32
    return %c0_i32, %c0_i32_0, %c0_i32_1 : i32, i32, i32
  }
  func.func @transform_9(%arg0: i32) -> (i32, i32, i32) {
    %c0_i32 = arith.constant 0 : i32
    %c0_i32_0 = arith.constant 0 : i32
    %c0_i32_1 = arith.constant 0 : i32
    %c0_i32_2 = arith.constant 0 : i32
    return %c0_i32, %c0_i32_0, %c0_i32_1 : i32, i32, i32
  }
  func.func @transform_10(%arg0: i32) -> (i32, i32, i32) {
    %c0_i32 = arith.constant 0 : i32
    %c0_i32_0 = arith.constant 0 : i32
    %c0_i32_1 = arith.constant 0 : i32
    %c0_i32_2 = arith.constant 0 : i32
    return %c0_i32, %c0_i32_0, %c0_i32_1 : i32, i32, i32
  }
  func.func @transform_11(%arg0: i32) -> (i32, i32, i32) {
    %c0_i32 = arith.constant 0 : i32
    %c0_i32_0 = arith.constant 0 : i32
    %c0_i32_1 = arith.constant 0 : i32
    %c0_i32_2 = arith.constant 0 : i32
    return %c0_i32, %c0_i32_0, %c0_i32_1 : i32, i32, i32
  }
  func.func @transform_12(%arg0: i32) -> (i32, i32, i32) {
    %c0_i32 = arith.constant 0 : i32
    %c0_i32_0 = arith.constant 0 : i32
    %c0_i32_1 = arith.constant 0 : i32
    %c0_i32_2 = arith.constant 0 : i32
    return %c0_i32, %c0_i32_0, %c0_i32_1 : i32, i32, i32
  }
  func.func @transform_13(%arg0: i32) -> i32 {
    %c0_i32 = arith.constant 0 : i32
    %c0_i32_0 = arith.constant 0 : i32
    return %c0_i32 : i32
  }
  func.func @transform_14(%arg0: i32) -> i32 {
    %c0_i32 = arith.constant 0 : i32
    %c0_i32_0 = arith.constant 0 : i32
    return %c0_i32 : i32
  }
  func.func @transform_15(%arg0: i32) -> i32 {
    %c0_i32 = arith.constant 0 : i32
    %c0_i32_0 = arith.constant 0 : i32
    return %c0_i32 : i32
  }
  func.func @transform_16(%arg0: i32) -> i32 {
    %c0_i32 = arith.constant 0 : i32
    %c0_i32_0 = arith.constant 0 : i32
    return %c0_i32 : i32
  }
  func.func @transform_17(%arg0: i32) -> (i32, i32) {
    %c0_i32 = arith.constant 0 : i32
    %c0_i32_0 = arith.constant 0 : i32
    %c0_i32_1 = arith.constant 0 : i32
    return %c0_i32, %c0_i32_0 : i32, i32
  }
}

</mosaic_0001>

<bundles_post_ra>
// kernel: tpu_custom_call.1
= control target key start
LH: loop header
LB: loop body
LE: loop exit
PB: predicated region body
PF: predicated region fallthrough
CT: control target
= control target key end

     0   :  { %s2323_s0 = inlined_call_operand.vmem [shape: bf16[16,128], index: 0, kind: input, shape index: {}]   ;;  %s2324_s1 = inlined_call_operand.vmem [shape: f32[16,1], index: 1, kind: input, shape index: {}]   ;;  %s2325_s2 = inlined_call_operand.vmem [shape: f32[16,1], index: 2, kind: input, shape index: {}]   ;;  %s2326_s3 = inlined_call_operand.vmem [shape: bf16[16,8], index: 3, kind: input, shape index: {}]   ;;  %s2327_s4 = inlined_call_operand.vmem [shape: bf16[8,16], index: 4, kind: input, shape index: {}]   ;;  %s2328_s5 = inlined_call_operand.hbm [shape: bf16[2,128,128], index: 5, kind: input, shape index: {}]   ;;  %s2329_s6 = inlined_call_operand.vmem [shape: f32[2,1,128], index: 6, kind: input, shape index: {}]   ;;  %s2330_s7 = inlined_call_operand.vmem [shape: f32[2,1,128], index: 7, kind: input, shape index: {}]   ;;  %s2331_s8 = inlined_call_operand.vmem [shape: f32[2,16,1], index: 8, kind: input, shape index: {}]   ;;  %s2332_s9 = inlined_call_operand.hbm [shape: bf16[2,128,128], index: 9, kind: input, shape index: {}]   ;;  %s2333_s10 = inlined_call_operand.hbm [shape: bf16[2,128,128], index: 10, kind: input, shape index: {}]   ;;  %s2334_s11 = inlined_call_operand.vmem [shape: f32[2,1,128], index: 11, kind: input, shape index: {}]   ;;  %s2335_s12 = inlined_call_operand.vmem [shape: f32[2,16,128], index: 12, kind: input, shape index: {}]   ;;  %s2336_s13 = inlined_call_operand.vmem [shape: f32[2], index: 13, kind: input, shape index: {}]   ;;  %s2337_s14 = inlined_call_operand.vmem [shape: f32[2], index: 14, kind: input, shape index: {}]   ;;  %s2338_s15 = inlined_call_operand.vmem [shape: f32[2], index: 15, kind: input, shape index: {}]   ;;  %s2339_s16 = inlined_call_operand.vmem [shape: f32[2], index: 16, kind: input, shape index: {}]   ;;  %s2340_s17 = inlined_call_operand.hbm [shape: f32[16,128], index: 17, kind: output, shape index: {}]  }
   0x1   :  { %2350 = sst [smem:[#allocation23_spill]] %s2323_s0 }
   0x2   :  { %2351 = sst [smem:[#allocation24_spill]] %s2324_s1 }
   0x3   :  { %2352 = sst [smem:[#allocation25_spill]] %s2332_s9 }
   0x4   :  { %2353 = sst [smem:[#allocation26_spill]] %s2337_s14 }
   0x5   :  { %2354 = sst [smem:[#allocation27_spill]] %s2340_s17 }
   0x6   :  { %22 = vsyncpa [#allocation3], 0 }
   0x7   :  { %23 = vsyncpa [#allocation7], 0 }
   0x8   :  { %24 = vsyncpa [#allocation5], 0 }
   0x9   :  { %25 = vsyncpa [#allocation11], 0 }
   0xa   :  { %26 = vsyncpa [#allocation14], 0 }
   0xb   :  { %27 = vsyncpa [#allocation4], 0  ;;  %s1970_s24 = smov 0  }
   0xc LB: > { %2355 = sst [smem:[#allocation22_spill]] %s1862_s24  ;;  %s1976_s25 = sadd.s32 4294967295, %s1862_s24   ;;  %s1862_s24 = sphi %s1970_s24, %s33_s24  }
   0xd   : > { %p1361_p0 = scmp.ge.s32.totalorder %s1862_s24, 1  ;;  %p416_p1 = scmp.lt.s32.totalorder %s1862_s24, 5 }
   0xe   : > { %p2348_p3 = scmp.eq.s32.totalorder %s1976_s25, 0  ;;  %s1864_s27 = smov [#allocation6]  }
   0xf   : > { %p1982_p4 = pnand %p1361_p0, %p416_p1  ;;  %s465_s28 = sshll.u32 %s1864_s27, 4  ;;  %s1986_s28 = int_to_ptr.vmem [resolvable:$true] %s465_s28 }
  0x10   : > { %s2357_s14 = sld [smem:[#allocation26_spill]]  ;;  %s1865_s19 = smov [#allocation2]  }
  0x11   : > { %s2356_s26 = scalar_select %p1982_p4, 1, 0 }
  0x12   : > { %p1558_p5 = pneg %p1982_p4  ;;  %s443_s1 = sshll.u32 %s1865_s19, 4  ;;  %s2001_s1 = int_to_ptr.vmem [resolvable:$true] %s443_s1 }
  0x13   : > { %s1866_s20 = smov [#allocation8]   ;;  %s2359_s9 = sld [smem:[#allocation25_spill]] }
  0x14   : > { %p1997_p6 = pnand %p2348_p3, %p1558_p5  ;;  %s2003_s21 = sshll.u32 %s1866_s20, 4  ;;  %s479_s21 = int_to_ptr.vmem [resolvable:$true] %s2003_s21 }
  0x16   : > { %s509_s30 = sshll.u32 %s2357_s14, 4  ;;  %p2013_p8 = pneg %p1997_p6  ;;  %s1993_s30 = int_to_ptr.vmem [resolvable:$true] %s509_s30 }
  0x19   : > { %s1662_s27 = scalar_lea.hbm %s2359_s9, 2048 }
  0x1a   : > { %p1663_p7 = scmp.ne.s32.totalorder %s2359_s9, %s1662_s27  ;;  %p1669_p11 = scmp.lt.u32.totalorder %s1662_s27, %s2359_s9 }
  0x1c   : > { %p1665_p9 = pnand %p2013_p8, %p1663_p7 }
  0x1e   : > { %p1666_p10 = pneg %p1665_p9 }
  0x20   : > { %p1671_p12 = pnand %p1669_p11, %p1666_p10 }
  0x22   : > { %1674 = shalt.err (!%p1671_p12)
}
  0x23   : > { %s1675_s22 = scalar_lea.vmem %s1986_s28, 2048  ;;  %p1683_p5 = scmp.lt.s32.totalorder %s1986_s28, %s1986_s28 }
  0x24   : > { %p1676_p13 = scmp.ne.s32.totalorder %s1986_s28, %s1675_s22  ;;  %p1684_p2 = scmp.lt.s32.totalorder %s1675_s22, %s1675_s22 }
  0x26   : > { %p1678_p0 = pnand %p1676_p13, %p2013_p8  ;;  %p1685_p7 = por %p1684_p2, %p1683_p5 }
  0x28   : > { %p1679_p1 = pneg %p1678_p0 }
  0x2a   : > { %p1686_p9 = pnand %p1685_p7, %p1679_p1 }
  0x2c   : > { %1689 = shalt.err (!%p1686_p9)
}
  0x2d   : > { %s2342_s23 = smov 64   ;;  %s2344_s27 = smov 4  }
  0x2e   : > { %1564 = dma.hbm_to_vmem [thread:$0]  (!%p1997_p6), %s2359_s9, 2048, %s1986_s28, [#allocation7], %s2342_s23, %s2342_s23, %s2344_s27  }
  0x2f   : > { %s1690_s19 = scalar_lea.vmem %s1993_s30, 16  ;;  %p1698_p12 = scmp.lt.s32.totalorder %s1993_s30, %s1993_s30 }
  0x30   : > { %p1691_p2 = scmp.ne.s32.totalorder %s1993_s30, %s1690_s19  ;;  %p1699_p13 = scmp.lt.s32.totalorder %s1690_s19, %s1690_s19 }
  0x32   : > { %p1693_p10 = pnand %p1691_p2, %p2013_p8  ;;  %p1700_p0 = por %p1699_p13, %p1698_p12 }
  0x34   : > { %p1694_p11 = pneg %p1693_p10 }
  0x36   : > { %p1701_p1 = pnand %p1700_p0, %p1694_p11 }
  0x38   : > { %1704 = shalt.err (!%p1701_p1)
}
  0x39   : > { %s1869_s20 = smov [#allocation10]   ;;  %s1705_s28 = scalar_lea.hbm %s2328_s5, 2048 }
  0x3a   : > { %1573 = dma.vmem_to_smem (!%p1997_p6), %s1993_s30, 16, %s1869_s20, [#allocation11]  }
  0x3b   : > { %p1706_p5 = scmp.ne.s32.totalorder %s2328_s5, %s1705_s28  ;;  %p1712_p2 = scmp.lt.u32.totalorder %s1705_s28, %s2328_s5 }
  0x3d   : > { %p1708_p7 = pnand %p1706_p5, %p2013_p8 }
  0x3f   : > { %p1709_p9 = pneg %p1708_p7 }
  0x41   : > { %p1714_p10 = pnand %p1712_p2, %p1709_p9 }
  0x43   : > { %1717 = shalt.err (!%p1714_p10)
}
  0x44   : > { %s1718_s30 = scalar_lea.vmem %s2001_s1, 2048  ;;  %p1726_p0 = scmp.lt.s32.totalorder %s2001_s1, %s2001_s1 }
  0x45   : > { %p1719_p11 = scmp.ne.s32.totalorder %s2001_s1, %s1718_s30  ;;  %p1727_p1 = scmp.lt.s32.totalorder %s1718_s30, %s1718_s30 }
  0x47   : > { %p1721_p12 = pnand %p1719_p11, %p2013_p8  ;;  %p1728_p5 = por %p1727_p1, %p1726_p0 }
  0x49   : > { %p1722_p13 = pneg %p1721_p12 }
  0x4b   : > { %p1729_p7 = pnand %p1728_p5, %p1722_p13 }
  0x4d   : > { %1732 = shalt.err (!%p1729_p7)
}
  0x4e   : > { %s2361_s23 = smov 4   ;;  %s2362_s27 = smov 64  }
  0x4f   : > { %1561 = dma.hbm_to_vmem [thread:$0]  (!%p1997_p6), %s2328_s5, 2048, %s2001_s1, [#allocation3], %s2362_s27, %s2362_s27, %s2361_s23  }
  0x50   : > { %s498_s0 = sshll.u32 %s2336_s13, 4  ;;  %s1733_s9 = scalar_lea.hbm %s2333_s10, 2048  ;;  %s499_s0 = int_to_ptr.vmem [resolvable:$true] %s498_s0 }
  0x51   : > { %p1734_p9 = scmp.ne.s32.totalorder %s2333_s10, %s1733_s9  ;;  %p1740_p11 = scmp.lt.u32.totalorder %s1733_s9, %s2333_s10 }
  0x53   : > { %p1736_p2 = pnand %p1734_p9, %p2013_p8 }
  0x55   : > { %p1737_p10 = pneg %p1736_p2 }
  0x57   : > { %p1742_p12 = pnand %p1740_p11, %p1737_p10 }
  0x59   : > { %1745 = shalt.err (!%p1742_p12)
}
  0x5a   : > { %s1746_s1 = scalar_lea.vmem %s479_s21, 2048  ;;  %p1754_p5 = scmp.lt.s32.totalorder %s479_s21, %s479_s21 }
  0x5b   : > { %p1747_p13 = scmp.ne.s32.totalorder %s479_s21, %s1746_s1  ;;  %p1755_p7 = scmp.lt.s32.totalorder %s1746_s1, %s1746_s1 }
  0x5d   : > { %p1749_p0 = pnand %p1747_p13, %p2013_p8  ;;  %p1756_p3 = por %p1755_p7, %p1754_p5 }
  0x5f   : > { %p1750_p1 = pneg %p1749_p0 }
  0x61   : > { %p1757_p4 = pnand %p1756_p3, %p1750_p1 }
  0x63   : > { %1760 = shalt.err (!%p1757_p4)
}
  0x64   : > { %1567 = dma.hbm_to_vmem [thread:$0]  (!%p1997_p6), %s2333_s10, 2048, %s479_s21, [#allocation7], %s2362_s27, %s2362_s27, %s2361_s23  }
  0x65   : > { %s1761_s24 = scalar_lea.vmem %s499_s0, 16  ;;  %p1769_p11 = scmp.lt.s32.totalorder %s499_s0, %s499_s0 }
  0x66   : > { %p1762_p9 = scmp.ne.s32.totalorder %s499_s0, %s1761_s24  ;;  %p1770_p12 = scmp.lt.s32.totalorder %s1761_s24, %s1761_s24 }
  0x68   : > { %p1764_p2 = pnand %p1762_p9, %p2013_p8  ;;  %p1771_p3 = por %p1770_p12, %p1769_p11 }
  0x6a   : > { %p1765_p10 = pneg %p1764_p2 }
  0x6c   : > { %p1772_p4 = pnand %p1771_p3, %p1765_p10 }
  0x6e   : > { %1775 = shalt.err (!%p1772_p4)
}
  0x6f   : > { %s1870_s29 = smov [#allocation9]   ;;  %s520_s21 = sshll.u32 %s2338_s15, 4  ;;  %s521_s21 = int_to_ptr.vmem [resolvable:$true] %s520_s21 }
  0x70   : > { %1570 = dma.vmem_to_smem (!%p1997_p6), %s499_s0, 16, %s1870_s29, [#allocation5]  }
  0x71   : > { %s531_s30 = sshll.u32 %s2339_s16, 4  ;;  %s1776_s20 = scalar_lea.vmem %s521_s21, 16  ;;  %s532_s30 = int_to_ptr.vmem [resolvable:$true] %s531_s30 }
  0x72   : > { %p1777_p13 = scmp.ne.s32.totalorder %s521_s21, %s1776_s20  ;;  %p1784_p5 = scmp.lt.s32.totalorder %s521_s21, %s521_s21 }
  0x73   : > { %p1785_p7 = scmp.lt.s32.totalorder %s1776_s20, %s1776_s20 }
  0x74   : > { %p1779_p0 = pnand %p1777_p13, %p2013_p8 }
  0x75   : > { %p1786_p9 = por %p1785_p7, %p1784_p5 }
  0x76   : > { %p1780_p1 = pneg %p1779_p0 }
  0x78   : > { %p1787_p2 = pnand %p1786_p9, %p1780_p1 }
  0x7a   : > { %1790 = shalt.err (!%p1787_p2)
}
  0x7b   : > { %s1871_s0 = smov [#allocation12]   ;;  %s1791_s22 = scalar_lea.vmem %s532_s30, 16 }
  0x7c   : > { %1576 = dma.vmem_to_smem (!%p1997_p6), %s521_s21, 16, %s1871_s0, [#allocation11]  }
  0x7d   : > { %p1792_p10 = scmp.ne.s32.totalorder %s532_s30, %s1791_s22  ;;  %p1799_p3 = scmp.lt.s32.totalorder %s532_s30, %s532_s30 }
  0x7e   : > { %p1800_p4 = scmp.lt.s32.totalorder %s1791_s22, %s1791_s22 }
  0x7f   : > { %p1794_p11 = pnand %p1792_p10, %p2013_p8 }
  0x80   : > { %p1801_p13 = por %p1800_p4, %p1799_p3 }
  0x81   : > { %p1795_p12 = pneg %p1794_p11 }
  0x83   : > { %p1802_p0 = pnand %p1801_p13, %p1795_p12 }
  0x85   : > { %1805 = shalt.err (!%p1802_p0)
}
  0x86   : > { %s1872_s1 = smov [#allocation13]   ;;  %p2363_p1 = scmp.ne.s32.totalorder %s2356_s26, 0 }
  0x87   : > { %1579 = dma.vmem_to_smem (!%p1997_p6), %s532_s30, 16, %s1872_s1, [#allocation14]  }
  0x88   : > { %544 = sbr.rel (%p2363_p1) target bundleno = 1631 (0x65f), region = 88  ;;  %p2364_p5 = scmp.eq.s32.totalorder (!%p2363_p1), %s1976_s25, 0 }
  0x8f   : > { %1837 = dma.done.wait (%p2364_p5), [#allocation3], 2048   ;;  %p2365_p7 = pmov %p2364_p5 }
  0x90   : > { %p2366_p8 = pmov %p2364_p5 }
  0x91   : > { %1839 = vsyncadd (%p2365_p7), [#allocation3], 4294965248 }
  0x92   : > { %1841 = dma.done.wait (%p2366_p8), [#allocation7], 4096   ;;  %p2367_p9 = pmov %p2364_p5 }
  0x93   : > { %p2368_p2 = pmov %p2364_p5 }
  0x94   : > { %1843 = vsyncadd (%p2367_p9), [#allocation7], 4294963200 }
  0x95   : > { %1845 = dma.done.wait (%p2368_p2), [#allocation5], 16   ;;  %p2369_p6 = pmov %p2368_p2 }
  0x96   : > { %p2370_p10 = pmov %p2368_p2 }
  0x97   : > { %1847 = vsyncadd (%p2369_p6), [#allocation5], 4294967280 }
  0x98   : > { %1849 = dma.done.wait (%p2370_p10), [#allocation11], 32   ;;  %p2371_p11 = pmov %p2368_p2 }
  0x99   : > { %p2372_p12 = pmov %p2368_p2 }
  0x9a   : > { %1851 = vsyncadd (%p2371_p11), [#allocation11], 4294967264 }
  0x9b   : > { %1853 = dma.done.wait (%p2372_p12), [#allocation14], 16   ;;  %p2373_p3 = pmov %p2368_p2 }
  0x9d   : > { %1855 = vsyncadd (%p2373_p3), [#allocation14], 4294967280 }
  0x9e   : > { %574 = sfence }
  0x9f   : > { %p612_p4 = scmp.lt.s32.totalorder %s1976_s25, 0  ;;  %s613_s14 = ssub.s32 0, %s1976_s25 }
  0xa0   : > { %s1377_s26 = smin.u32 %s1976_s25, %s613_s14  ;;  %p2374_p0 = scmp.ne.s32.totalorder %s1976_s25, 0 }
  0xa1   : > { %s615_s18 = sand.u32 1, %s1377_s26   ;;  %v1873_v0 = vmov (!%p2374_p0), 0.0  }
  0xa2   : > { %s616_s17 = ssub.s32 0, %s615_s18  ;;  %627 = sbr.rel (%p2374_p0) target bundleno = 169 (0xa9), region = 120  ;;  %628 = vst [vmem:[#allocation15] sm:$0xff] (!%p2374_p0), %v1873_v0  ;;  %629 = vst [vmem:[#allocation15 + $0x8] sm:$0xff] (!%p2374_p0), %v1873_v0 }
  0xa3   : > { %s2381_s17 = smov (!%p612_p4, %s616_s17), %s615_s18 }
  0xa4   : > { %p1379_p13 = scmp.lt.s32.totalorder %s2381_s17, 0  ;;  %s622_s9 = sadd.s32 2, %s2381_s17 }
  0xa6   : > { %s2383_s9 = smov (!%p1379_p13, %s622_s9), %s2381_s17 }
  0xa9 PF: > { %s1420_s24 = sshll.u32 %s2383_s9, 6  ;;  %v1874_v1 = vmov 0.0   ;;  %vm1875_vm0 = vmmov 0   ;;  %s2375_s27 = sld [smem:[#allocation23_spill]]  ;;  %v1876_v23 = vmov 0   ;;  %v773_v26 = vld [vmem:[%s2325_s2] sm:$0xff] }
  0xaa   : > { %1454 = vmatprep.subr.bf16.mxu0 %v1874_v1  ;;  %1470 = vmatprep.mubr.msk.bf16.mxu0 %vm1875_vm0, %v1874_v1  ;;  %s636_s29 = scalar_lea.vmem [#allocation2], %s1420_s24  ;;  %s2153_s28 = scalar_lea.vmem [#allocation8], %s1420_s24  ;;  %v774_v33 = vld [vmem:[%s2325_s2 + $0x8] sm:$0xff]  ;;  %vm818_vm1 = vcmask 7168   ;;  %vm860_vm2 = vcmask 130048   ;;  %vm916_vm3 = vcmask 1043456  }
  0xab   : > { %v1622_v2 = vld [vmem:[%s636_s29] sm:$0xff]   ;;  %1474 = vmatprep.subr.bf16.mxu1 %v1874_v1  ;;  %1476 = vmatprep.mubr.msk.bf16.mxu1 %vm1875_vm0, %v1874_v1  ;;  %v1623_v3 = vld [vmem:[%s636_s29 + $0x8] sm:$0xff]   ;;  %v1624_v4 = vld [vmem:[%s636_s29 + $0x10] sm:$0xff]   ;;  %s2155_s19 = scalar_lea.vmem [#allocation6], %s1420_s24  ;;  %s653_s0 = scalar_lea.vmem %s2329_s6, %s2383_s9  ;;  %vm912_vm4 = vcmask 64512  }
  0xac   : > { %1455 = vmatpush3.bf16.msra.mxu0 %v1622_v2  ;;  %v1625_v5 = vld [vmem:[%s636_s29 + $0x18] sm:$0xff]   ;;  %v1626_v6 = vld [vmem:[%s636_s29 + $0x20] sm:$0xff]   ;;  %v1627_v7 = vld [vmem:[%s636_s29 + $0x28] sm:$0xff]   ;;  %s787_s14 = scalar_lea.vmem %s2330_s7, %s2383_s9  ;;  %1621 = vset.pattern.permute.xlu1 %v1876_v23  ;;  %s2376_s17 = sld [smem:[#allocation24_spill]] }
  0xad   : > { %1456 = vmatprep.subr.bf16.mxu0 %v1874_v1  ;;  %v1628_v8 = vld [vmem:[%s636_s29 + $0x30] sm:$0xff]   ;;  %v1629_v9 = vld [vmem:[%s636_s29 + $0x38] sm:$0xff]   ;;  %v1383_v11 = vld [vmem:[%s653_s0] ss:$0 sm:$0xff]  ;;  %1620 = vset.pattern.permute.xlu0 %v1876_v23  ;;  %s806_s20 = sld [smem:[#allocation9 + %s2383_s9]]  ;;  %s1381_s0 = sshll.u32 %s2383_s9, 4 }
  0xae   : > { %v1393_v19 = vld [vmem:[%s787_s14] ss:$0 sm:$0xff]  ;;  %s801_s14 = scalar_lea.vmem %s2331_s8, %s1381_s0  ;;  %s814_s26 = sld [smem:[#allocation10 + %s2383_s9]] }
  0xaf   : > { %v1630_v10 = vld [vmem:[%s2375_s27] sm:$0xff]   ;;  %v803_v50 = vld [vmem:[%s801_s14 + $0x8] sm:$0xff]  ;;  %s1212_s30 = scalar_lea.vmem %s2334_s11, %s2383_s9  ;;  %s1222_s1 = scalar_lea.vmem %s2335_s12, %s1381_s0 }
  0xb0   : > { %1457 = vmatpush3.bf16.msra.mxu0 %v1623_v3  ;;  %v802_v46 = vld [vmem:[%s801_s14] sm:$0xff]  ;;  %p1594_p1 = scmp.eq.s32.totalorder %s1976_s25, 3 }
  0xb1   : > { %1458 = vmatprep.subr.bf16.mxu0 %v1874_v1 }
  0xb2   : > { %v766_v24 = vld [vmem:[%s2376_s17] sm:$0xff]  ;;  %v767_v29 = vld [vmem:[%s2376_s17 + $0x8] sm:$0xff] }
  0xb3   : > { %v807_v48 = vstv %s806_s20 }
  0xb4   : > { %1459 = vmatpush3.bf16.msra.mxu0 %v1624_v4  ;;  %v815_v58 = vstv %s814_s26 }
  0xb5   : > { %1460 = vmatprep.subr.bf16.mxu0 %v1874_v1 }
  0xb8   : > { %1461 = vmatpush3.bf16.msra.mxu0 %v1625_v5 }
  0xb9   : > { %1462 = vmatprep.subr.bf16.mxu0 %v1874_v1 }
  0xbc   : > { %1463 = vmatpush3.bf16.msra.mxu0 %v1626_v6 }
  0xbd   : > { %1464 = vmatprep.subr.bf16.mxu0 %v1874_v1 }
  0xc0   : > { %1465 = vmatpush3.bf16.msra.mxu0 %v1627_v7 }
  0xc1   : > { %1466 = vmatprep.subr.bf16.mxu0 %v1874_v1 }
  0xc4   : > { %1467 = vmatpush3.bf16.msra.mxu0 %v1628_v8 }
  0xc5   : > { %1468 = vmatprep.subr.bf16.mxu0 %v1874_v1 }
  0xc8   : > { %1469 = vmatpush3.bf16.msra.mxu0 %v1629_v9 }
  0xc9   : > { %1506 = vmatprep.subr.bf16.mxu0 %v1874_v1 }
  0xcb   : > { %1471 = vmatmul.mubr.bf16.vlgmr.msra.gmra.mrb[0].mxu0 %v1630_v10 }
  0xcc   : > { %1522 = vmatprep.mubr.msk.bf16.mxu0 %vm1875_vm0, %v1874_v1 }
 0x19e   : > { %v749_v12 = vpop.f32.mrb[0].mxu0 }
 0x19f   : > { %v2172_v13 = vadd.f32 %v1383_v11, %v749_v12  ;;  %v1472_v14 = vpop.f32.mrb[1].mxu0 }
 0x1a0   : > { %v752_v15 = vpop.f32.mrb[2].mxu0 }
 0x1a1   : > { %v2174_v16 = vadd.f32 %v1383_v11, %v752_v15  ;;  %756 = vadd.xlane.f32.xlu0 %v2172_v13  ;;  %v1473_v17 = vpop.f32.mrb[3].mxu0  ;;  %v760_v18 = vmul.f32 %v2172_v13, %v2172_v13  ;;  %v795_v21 = vmul.f32 %v1393_v19, %v2172_v13 }
 0x1a3   : > { %762 = vadd.xlane.f32.xlu1 %v760_v18  ;;  %v761_v20 = vmul.f32 %v2174_v16, %v2174_v16  ;;  %v796_v22 = vmul.f32 %v1393_v19, %v2174_v16 }
 0x1a5   : > { %758 = vadd.xlane.f32.xlu0 %v2174_v16 }
 0x1a7   : > { %764 = vadd.xlane.f32.xlu1 %v761_v20 }
 0x1a9   : > { %797 = vadd.xlane.f32.xlu0 %v795_v21 }
 0x1ab   : > { %799 = vadd.xlane.f32.xlu1 %v796_v22 }
 0x22e   : > { %v2191_v25 = vpop.xlane.xlu0 %756 }
 0x22f   : > { %v768_v27 = vadd.f32 %v766_v24, %v2191_v25 }
 0x230   : > { %v2197_v28 = vpop.xlane.xlu1 %762 }
 0x231   : > { %v771_v30 = vmul.f32 0.025, %v768_v27  ;;  %v775_v31 = vadd.f32 %v773_v26, %v2197_v28 }
 0x232   : > { %v2203_v32 = vpop.xlane.xlu0 %758 }
 0x233   : > { %v779_v34 = vmul.f32 %v771_v30, %v771_v30  ;;  %v777_v35 = vmul.f32 0.025, %v775_v31  ;;  %v769_v36 = vadd.f32 %v767_v29, %v2203_v32  ;;  %v808_v52 = vmul.f32 %v807_v48, %v771_v30 }
 0x234   : > { %v2209_v37 = vpop.xlane.xlu1 %764 }
 0x235   : > { %v781_v38 = vsub.f32 %v777_v35, %v779_v34  ;;  %v772_v39 = vmul.f32 0.025, %v769_v36  ;;  %v776_v40 = vadd.f32 %v774_v33, %v2209_v37 }
 0x236   : > { %v798_v47 = vpop.xlane.xlu0 %797 }
 0x237   : > { %v783_v41 = vadd.f32 1e-05, %v781_v38  ;;  %v780_v42 = vmul.f32 %v772_v39, %v772_v39  ;;  %v778_v43 = vmul.f32 0.025, %v776_v40  ;;  %v804_v49 = vadd.f32 %v802_v46, %v798_v47  ;;  %v1631_v46 = vld [vmem:[%s2326_s3] sm:$0xff]  }
 0x238   : > { %v800_v51 = vpop.xlane.xlu1 %799  ;;  %v809_v56 = vmul.f32 %v807_v48, %v772_v39  ;;  %v859_v39 = vld [vmem:[%s2327_s4] sm:$0xf] }
 0x239   : > { %1648 = vrsqrt.f32 %v783_v41  ;;  %v782_v44 = vsub.f32 %v778_v43, %v780_v42  ;;  %v810_v53 = vsub.f32 %v804_v49, %v808_v52  ;;  %v805_v54 = vadd.f32 %v803_v50, %v800_v51 }
 0x23b   : > { %v784_v45 = vadd.f32 1e-05, %v782_v44  ;;  %v811_v59 = vsub.f32 %v805_v54, %v809_v56  ;;  %v1633_v54 = vld [vmem:[%s2155_s19] sm:$0xff]   ;;  %v1635_v56 = vld [vmem:[%s2155_s19 + $0x8] sm:$0xff]  }
 0x23c   : > { %1507 = vmatpush3.bf16.msra.mxu0 %v1633_v54 }
 0x23d   : > { %1650 = vrsqrt.f32 %v784_v45  ;;  %1508 = vmatprep.subr.bf16.mxu0 %v1874_v1 }
 0x240   : > { %1509 = vmatpush3.bf16.msra.mxu0 %v1635_v56 }
 0x241   : > { %1510 = vmatprep.subr.bf16.mxu0 %v1874_v1 }
 0x243   : > { %v1649_v55 = vpop.eup %1648 }
 0x244   : > { %v812_v57 = vmul.f32 %v1649_v55, %v810_v53  ;;  %v1632_v53 = vld [vmem:[%s2153_s28] sm:$0xff]   ;;  %v1634_v55 = vld [vmem:[%s2153_s28 + $0x8] sm:$0xff]  }
 0x246   : > { %v816_v61 = vadd.f32 %v815_v58, %v812_v57  ;;  %v1636_v57 = vld [vmem:[%s2153_s28 + $0x10] sm:$0xff]  }
 0x247   : > { %v1651_v60 = vpop.eup %1650 }
 0x248   : > { %v813_v62 = vmul.f32 %v1651_v60, %v811_v59  ;;  %v819_v0 = vsel %vm818_vm1, %v816_v61, -inf  ;;  %v1638_v59 = vld [vmem:[%s2153_s28 + $0x18] sm:$0xff]  }
 0x249   : > { %v1639_v60 = vld [vmem:[%s2155_s19 + $0x18] sm:$0xff]  }
 0x24a   : > { %v817_v63 = vadd.f32 %v815_v58, %v813_v62  ;;  %v1637_v58 = vld [vmem:[%s2155_s19 + $0x10] sm:$0xff]   ;;  %v1641_v62 = vld [vmem:[%s2155_s19 + $0x20] sm:$0xff]  }
 0x24b   : > { %1511 = vmatpush3.bf16.msra.mxu0 %v1637_v58 }
 0x24c   : > { %v820_v2 = vsel %vm818_vm1, %v817_v63, -inf  ;;  %1512 = vmatprep.subr.bf16.mxu0 %v1874_v1 }
 0x24d   : > { %v821_v3 = vmax.f32 %v819_v0, %v820_v2  ;;  %v1643_v0 = vld [vmem:[%s2155_s19 + $0x28] sm:$0xff]   ;;  %v1644_v2 = vld [vmem:[%s2153_s28 + $0x30] sm:$0xff]  }
 0x24f   : > { %v822_v4 = vrot.slane %v821_v3, 4  ;;  %1513 = vmatpush3.bf16.msra.mxu0 %v1639_v60 }
 0x250   : > { %1514 = vmatprep.subr.bf16.mxu0 %v1874_v1 }
 0x251   : > { %v823_v5 = vmax.f32 %v821_v3, %v822_v4  ;;  %v1645_v3 = vld [vmem:[%s2155_s19 + $0x30] sm:$0xff]   ;;  %v1646_v4 = vld [vmem:[%s2153_s28 + $0x38] sm:$0xff]  }
 0x253   : > { %v824_v6 = vrot.slane %v823_v5, 2  ;;  %1515 = vmatpush3.bf16.msra.mxu0 %v1641_v62 }
 0x254   : > { %1516 = vmatprep.subr.bf16.mxu0 %v1874_v1 }
 0x255   : > { %v825_v7 = vmax.f32 %v823_v5, %v824_v6  ;;  %v1647_v5 = vld [vmem:[%s2155_s19 + $0x38] sm:$0xff]   ;;  %s1231_s19 = sld [smem:[#allocation13 + %s2383_s9]] }
 0x257   : > { %v826_v8 = vrot.slane %v825_v7, 1  ;;  %1517 = vmatpush3.bf16.msra.mxu0 %v1643_v0 }
 0x258   : > { %1518 = vmatprep.subr.bf16.mxu0 %v1874_v1 }
 0x259   : > { %v827_v9 = vmax.f32 %v825_v7, %v826_v8 }
 0x25b   : > { %v828_v10 = vsub.f32 %v816_v61, %v827_v9  ;;  %v829_v11 = vsub.f32 %v817_v63, %v827_v9  ;;  %v1640_v61 = vld [vmem:[%s2153_s28 + $0x20] sm:$0xff]   ;;  %v1642_v63 = vld [vmem:[%s2153_s28 + $0x28] sm:$0xff]   ;;  %1519 = vmatpush3.bf16.msra.mxu0 %v1645_v3  ;;  %s1227_s28 = sld [smem:[#allocation12 + %s2383_s9]]  ;;  %s1877_s9 = smov [#allocation15]  }
 0x25c   : > { %1520 = vmatprep.subr.bf16.mxu0 %v1874_v1  ;;  %s1245_s0 = sshll.u32 %s1877_s9, 4  ;;  %s1246_s0 = int_to_ptr.vmem [resolvable:$true] %s1245_s0 }
 0x25d   : > { %v830_v12 = vmul.f32 1.442695, %v828_v10  ;;  %v832_v14 = vmul.f32 1.442695, %v829_v11  ;;  %s1806_s14 = scalar_lea.vmem %s1246_s0, 256  ;;  %p1813_p9 = scmp.lt.s32.totalorder %s1246_s0, %s1246_s0 }
 0x25e   : > { %p1807_p5 = scmp.ne.s32.totalorder %s1246_s0, %s1806_s14  ;;  %p1814_p2 = scmp.lt.s32.totalorder %s1806_s14, %s1806_s14 }
 0x25f   : > { %1652 = vpow2.f32 %v830_v12  ;;  %1521 = vmatpush3.bf16.msra.mxu0 %v1647_v5 }
 0x260   : > { %1654 = vpow2.f32 %v832_v14  ;;  %p1808_p7 = pnand %p1807_p5, %p1594_p1  ;;  %p1815_p6 = por %p1814_p2, %p1813_p9 }
 0x262   : > { %p1809_p8 = pneg %p1808_p7 }
 0x264   : > { %p1816_p10 = pnand %p1815_p6, %p1809_p8 }
 0x269   : > { %v1653_v15 = vpop.eup %1652 }
 0x26a   : > { %v1655_v17 = vpop.eup %1654  ;;  %v834_v18 = vsel %vm818_vm1, %v1653_v15, 0.0 }
 0x26b   : > { %v835_v19 = vsel %vm818_vm1, %v1655_v17, 0.0 }
 0x26c   : > { %v836_v20 = vadd.f32 %v835_v19, %v834_v18 }
 0x26e   : > { %v837_v21 = vrot.slane %v836_v20, 4 }
 0x270   : > { %v838_v22 = vadd.f32 %v837_v21, %v836_v20 }
 0x272   : > { %v839_v23 = vrot.slane %v838_v22, 2 }
 0x274   : > { %v840_v24 = vadd.f32 %v839_v23, %v838_v22 }
 0x276   : > { %v841_v26 = vrot.slane %v840_v24, 1 }
 0x278   : > { %v842_v27 = vadd.f32 %v841_v26, %v840_v24 }
 0x27a   : > { %1656 = vrcp.f32 %v842_v27 }
 0x284   : > { %v1657_v29 = vpop.eup %1656 }
 0x285   : > { %v845_v30 = vmul.f32 %v1657_v29, %v1655_v17  ;;  %v844_v31 = vmul.f32 %v1657_v29, %v1653_v15 }
 0x287   : > { %853 = vperm.xlu1 %1621, %v845_v30   ;;  %848 = vperm.xlu0 %1620, %v844_v31  }
 0x306   : > { %v854_v33 = vpop.permute.xlu1 %853  ;;  %v849_v34 = vpop.permute.xlu0 %848 }
 0x307   : > { %v857_v35 = vmul.f32 %v854_v33, %v2174_v16  ;;  %v856_v36 = vmul.f32 %v849_v34, %v2172_v13 }
 0x309   : > { %v858_v38 = vpack.c.bf16 %v857_v35, %v856_v36  ;;  %v1415_v36 = vld [vmem:[%s1212_s30] ss:$0 sm:$0xff] }
 0x30b   : > { %1475 = vmatpush3.bf16.msra.mxu1 %v858_v38 }
 0x30c   : > { %1480 = vmatprep.subr.bf16.mxu1 %v1874_v1 }
 0x30e   : > { %1477 = vmatmul.mubr.msk.bf16.vlgmr.msra.gmra.mrb[0].mxu1 %vm860_vm2, %v859_v39 }
 0x30f   : > { %1482 = vmatprep.mubr.msk.bf16.mxu1 %vm1875_vm0, %v1874_v1 }
 0x3e1   : > { %v898_v40 = vpop.f32.mrb[0].mxu1 }
 0x3e2   : > { %v906_v41 = vpack.c.bf16 %v898_v40, %v898_v40  ;;  %v1478_v42 = vpop.f32.mrb[1].mxu1 }
 0x3e3   : > { %v901_v43 = vpop.f32.mrb[2].mxu1  ;;  %v1223_v42 = vld [vmem:[%s1222_s1] sm:$0xff] }
 0x3e4   : > { %v918_v44 = vsel %vm916_vm3, %v906_v41, 0  ;;  %v1479_v45 = vpop.f32.mrb[3].mxu1  ;;  %v630_v41 = vld [vmem:[#allocation15] sm:$0xff]  ;;  %v1228_v43 = vstv %s1227_s28 }
 0x3e5   : > { %1481 = vmatpush3.bf16.msra.mxu1 %v918_v44  ;;  %v1229_v54 = vmul.f32 %v1228_v43, %v630_v41 }
 0x3e6   : > { %1486 = vmatprep.subr.bf16.mxu1 %v1874_v1 }
 0x3e8   : > { %1483 = vmatmul.mubr.msk.bf16.vlgmr.msra.gmra.mrb[4].mxu1 %vm912_vm4, %v1631_v46 }
 0x3e9   : > { %1502 = vmatprep.mubr.msk.bf16.mxu1 %vm1875_vm0, %v1874_v1  ;;  %1487 = vmatpush3.bf16.msra.mxu1 %v1632_v53 }
 0x3ea   : > { %1488 = vmatprep.subr.bf16.mxu1 %v1874_v1 }
 0x3ed   : > { %1489 = vmatpush3.bf16.msra.mxu1 %v1634_v55 }
 0x3ee   : > { %1490 = vmatprep.subr.bf16.mxu1 %v1874_v1 }
 0x3f1   : > { %1491 = vmatpush3.bf16.msra.mxu1 %v1636_v57 }
 0x3f2   : > { %1492 = vmatprep.subr.bf16.mxu1 %v1874_v1 }
 0x3f5   : > { %1493 = vmatpush3.bf16.msra.mxu1 %v1638_v59 }
 0x3f6   : > { %1494 = vmatprep.subr.bf16.mxu1 %v1874_v1 }
 0x3f9   : > { %1495 = vmatpush3.bf16.msra.mxu1 %v1640_v61 }
 0x3fa   : > { %1496 = vmatprep.subr.bf16.mxu1 %v1874_v1 }
 0x3fd   : > { %1497 = vmatpush3.bf16.msra.mxu1 %v1642_v63 }
 0x3fe   : > { %1498 = vmatprep.subr.bf16.mxu1 %v1874_v1 }
 0x401   : > { %1499 = vmatpush3.bf16.msra.mxu1 %v1644_v2 }
 0x402   : > { %1500 = vmatprep.subr.bf16.mxu1 %v1874_v1 }
 0x405   : > { %1501 = vmatpush3.bf16.msra.mxu1 %v1646_v4 }
 0x4bb   : > { %v2238_v47 = vpop.f32.mrb[4].mxu1 }
 0x4bc   : > { %961 = vadd.xlane.f32.xlu1 %v2238_v47  ;;  %v1484_v48 = vpop.f32.mrb[5].mxu1  ;;  %v965_v50 = vmul.f32 %v2238_v47, %v2238_v47 }
 0x4bd   : > { %v2241_v49 = vpop.f32.mrb[6].mxu1 }
 0x4be   : > { %963 = vadd.xlane.f32.xlu0 %v2241_v49  ;;  %v1485_v51 = vpop.f32.mrb[7].mxu1  ;;  %v966_v52 = vmul.f32 %v2241_v49, %v2241_v49 }
 0x4bf   : > { %v631_v51 = vld [vmem:[#allocation15 + $0x8] sm:$0xff] }
 0x4c0   : > { %967 = vadd.xlane.f32.xlu1 %v965_v50  ;;  %v1232_v50 = vstv %s1231_s19  ;;  %v1230_v58 = vmul.f32 %v1228_v43, %v631_v51 }
 0x4c4   : > { %969 = vadd.xlane.f32.xlu1 %v966_v52  ;;  %v1224_v52 = vld [vmem:[%s1222_s1 + $0x8] sm:$0xff] }
 0x549   : > { %v962_v6 = vpop.xlane.xlu1 %961 }
 0x54a   : > { %v971_v7 = vadd.f32 %v962_v6, %v2191_v25 }
 0x54b   : > { %v964_v8 = vpop.xlane.xlu0 %963 }
 0x54c   : > { %v972_v9 = vadd.f32 %v964_v8, %v2203_v32  ;;  %v974_v10 = vmul.f32 0.015625, %v971_v7 }
 0x54d   : > { %v968_v11 = vpop.xlane.xlu1 %967 }
 0x54e   : > { %v976_v12 = vadd.f32 %v968_v11, %v2197_v28  ;;  %v975_v14 = vmul.f32 0.015625, %v972_v9  ;;  %v980_v15 = vmul.f32 %v974_v10, %v974_v10  ;;  %v988_v28 = vsub.f32 %v2172_v13, %v974_v10 }
 0x54f   : > { %v993_v24 = vsub.f32 %v2238_v47, %v974_v10 }
 0x550   : > { %v978_v17 = vmul.f32 0.015625, %v976_v12  ;;  %v981_v1 = vmul.f32 %v975_v14, %v975_v14  ;;  %v989_v26 = vsub.f32 %v2174_v16, %v975_v14 }
 0x551   : > { %v970_v18 = vpop.xlane.xlu1 %969 }
 0x552   : > { %v977_v19 = vadd.f32 %v970_v18, %v2209_v37  ;;  %v982_v20 = vsub.f32 %v978_v17, %v980_v15  ;;  %v994_v37 = vsub.f32 %v2241_v49, %v975_v14 }
 0x554   : > { %v979_v21 = vmul.f32 0.015625, %v977_v19  ;;  %v984_v22 = vadd.f32 1e-05, %v982_v20 }
 0x556   : > { %v983_v23 = vsub.f32 %v979_v21, %v981_v1  ;;  %1658 = vrsqrt.f32 %v984_v22 }
 0x558   : > { %v985_v25 = vadd.f32 1e-05, %v983_v23 }
 0x55a   : > { %1660 = vrsqrt.f32 %v985_v25 }
 0x560   : > { %v1659_v32 = vpop.eup %1658 }
 0x561   : > { %v995_v29 = vmul.f32 %v1659_v32, %v993_v24  ;;  %v990_v31 = vmul.f32 %v1659_v32, %v988_v28 }
 0x564   : > { %v1661_v27 = vpop.eup %1660 }
 0x565   : > { %v996_v30 = vmul.f32 %v1661_v27, %v994_v37  ;;  %v991_v33 = vmul.f32 %v1661_v27, %v989_v26 }
 0x567   : > { %v997_v34 = vpack.c.bf16 %v996_v30, %v995_v29  ;;  %v992_v35 = vpack.c.bf16 %v991_v33, %v990_v31 }
 0x569   : > { %1503 = vmatmul.mubr.bf16.vlgmr.msra.gmra.mrb[8].mxu1 %v997_v34  ;;  %1523 = vmatmul.mubr.bf16.vlgmr.msra.gmra.mrb[4].mxu0 %v992_v35 }
 0x63c   : > { %v1116_v13 = vpop.f32.mrb[8].mxu1  ;;  %v1205_v16 = vpop.f32.mrb[4].mxu0 }
 0x63d   : > { %v1206_v38 = vadd.f32 %v1205_v16, %v1116_v13  ;;  %v1504_v39 = vpop.f32.mrb[9].mxu1  ;;  %v1524_v40 = vpop.f32.mrb[5].mxu0 }
 0x63e   : > { %v1119_v44 = vpop.f32.mrb[10].mxu1  ;;  %v1208_v45 = vpop.f32.mrb[6].mxu0 }
 0x63f   : > { %v1220_v46 = vadd.f32 %v1415_v36, %v1206_v38  ;;  %v1209_v47 = vadd.f32 %v1208_v45, %v1119_v44  ;;  %v1505_v48 = vpop.f32.mrb[11].mxu1  ;;  %v1525_v49 = vpop.f32.mrb[7].mxu0 }
 0x641   : > { %v1225_v53 = vmul.f32 %v1223_v42, %v1220_v46  ;;  %v1221_v55 = vadd.f32 %v1415_v36, %v1209_v47 }
 0x643   : > { %v1233_v56 = vmul.f32 %v1232_v50, %v1225_v53  ;;  %v1226_v57 = vmul.f32 %v1224_v52, %v1221_v55 }
 0x645   : > { %v1235_v59 = vadd.f32 %v1233_v56, %v1229_v54  ;;  %v1234_v60 = vmul.f32 %v1232_v50, %v1226_v57 }
 0x647   : > { %1237 = vst [vmem:[#allocation15] sm:$0xff] %v1235_v59  ;;  %v1236_v61 = vadd.f32 %v1234_v60, %v1230_v58 }
 0x649   : > { %1238 = vst [vmem:[#allocation15 + $0x8] sm:$0xff] %v1236_v61 }
 0x64a   : > { %1819 = shalt.err (!%p1816_p10)
}
 0x64b   : > { %s2377_s24 = sld [smem:[#allocation27_spill]] }
 0x651   : > { %s2378_s29 = smov %s2377_s24  ;;  %s1820_s21 = scalar_lea.hbm %s2377_s24, 256 }
 0x652   : > { %p1821_p11 = scmp.ne.s32.totalorder %s2378_s29, %s1820_s21  ;;  %p1826_p4 = scmp.lt.u32.totalorder %s1820_s21, %s2378_s29 }
 0x654   : > { %p1822_p12 = pnand %p1821_p11, %p1594_p1 }
 0x656   : > { %p1823_p3 = pneg %p1822_p12 }
 0x658   : > { %p1828_p13 = pnand %p1826_p4, %p1823_p3 }
 0x65a   : > { %1831 = shalt.err (!%p1828_p13)
}
 0x65b   : > { %s1878_s30 = smov 128   ;;  %s1879_s20 = smov 8  }
 0x65c   : > { %1555 = dma.vmem_to_hbm [thread:$0]  (%p1594_p1), %s1246_s0, 256, %s2378_s29, [#allocation4], %s1878_s30, %s1878_s30, %s1879_s20  }
 0x65d   : > { %1857 = dma.done.wait (%p1594_p1), [#allocation4], 256  }
 0x65e   : > { %1859 = vsyncadd (%p1594_p1), [#allocation4], 4294967040 }
 0x65f PF: > { %s2379_s9 = sld [smem:[#allocation22_spill]] }
 0x665   : > { %s33_s24 = sadd.s32 1, %s2379_s9  }
 0x666   : > { %p30_p0 = scmp.ge.s32.totalorder %s33_s24, 6  }
 0x668   :  { %32 = sbr.rel (!%p30_p0) target bundleno = 12 (0xc), region = 154 }
 0x66f   :  { %1261 = vsyncpa [#allocation3], 1 }
 0x670   :  { %1263 = vsyncpa [#allocation3 + $0x1], 1 }
 0x671   :  { %1264 = vsyncpa [#allocation7], 1 }
 0x672   :  { %1265 = vsyncpa [#allocation4], 1 }
 0x673   :  { %1267 = vsyncpa [#allocation4 + $0x1], 1 }
 0x674   :  { %1268 = vsyncpa [#allocation5], 1 }
 0x675   :  { %1270 = vsyncpa [#allocation5 + $0x1], 1 }
 0x676   :  { %1271 = vsyncpa [#allocation11], 1 }
 0x677   :  { %1272 = vsyncpa [#allocation14], 1 }

</bundles_post_ra>
